<compile_context>
chip_gen: v7x
topology: tpu7x:2x2x1
jax: 0.10.0
libtpu: 0.0.40
codegen_flags: <defaults>
</compile_context>

<pallas_src>
import functools
import math

import jax
import jax.numpy as jnp
from jax import lax
from jax.experimental import pallas as pl
from jax.experimental.pallas import tpu as pltpu


def sigmoid_rampup(current, rampup_length):
    """Exponential rampup (host-side scalar, matches the PyTorch helper)."""
    if rampup_length == 0:
        return 1.0
    current = min(max(float(current), 0.0), float(rampup_length))
    phase = 1.0 - current / rampup_length
    return float(math.exp(-5.0 * phase * phase))


def _round_up(x, m):
    return ((x + m - 1) // m) * m


def _elr_plus_tile_kernel(logits_ref, y_ref, q_ref, ce_ref, reg_ref, *,
                          num_classes, true_b, tile_rows, tiles_per_core):
    core = pl.program_id(0)        # parallel axis (megacore split on v7x)
    step = pl.program_id(1)        # arbitrary (accumulation) axis

    @pl.when(step == 0)
    def _():
        ce_ref[...] = jnp.zeros_like(ce_ref)
        reg_ref[...] = jnp.zeros_like(reg_ref)

    logits = logits_ref[...].astype(jnp.float32)       # [TB, C]
    y = y_ref[...].astype(jnp.float32)                 # [TB, C]
    q = q_ref[...].astype(jnp.float32)                 # [1, C] or [TB, C]

    # softmax / log_softmax along classes (lane axis); one divide per row.
    m = jnp.max(logits, axis=1, keepdims=True)
    shifted = logits - m
    e = jnp.exp(shifted)
    s = jnp.sum(e, axis=1, keepdims=True)              # [TB, 1]
    inv_s = 1.0 / s                                    # per-row, reused below
    y_pred = jnp.clip(e * inv_s, 0.0001, 1.0 - 0.0001)
    log_softmax = shifted - jnp.log(s)

    if num_classes == 100:
        # y_labeled = y_labeled * q ; renormalize over classes.
        y = y * q
        y = y / jnp.sum(y, axis=1, keepdims=True)

    ce_rows = -jnp.sum(y * log_softmax, axis=1, keepdims=True)             # [TB,1]
    reg_rows = jnp.log(1.0 - jnp.sum(q * y_pred, axis=1, keepdims=True))   # [TB,1]

    # Mask rows that are batch padding (select, so padded NaNs don't leak).
    row0 = (core * tiles_per_core + step) * tile_rows
    rid = row0 + lax.broadcasted_iota(jnp.int32, (tile_rows, 1), 0)
    valid = rid < true_b

    ce_part = jnp.sum(jnp.where(valid, ce_rows, 0.0), keepdims=True)    # (1,1)
    reg_part = jnp.sum(jnp.where(valid, reg_rows, 0.0), keepdims=True)  # (1,1)

    ce_ref[...] += ce_part       # broadcast into the resident (8,128) block
    reg_ref[...] += reg_part


class ELRPlusLoss:
    """JAX/Pallas port of elr_plus_loss (forward pass)."""

    def __init__(self, num_examp, num_classes=10, beta=0.3, lmbd=3.0, coef_step=0):
        self.pred_hist = jnp.zeros((num_examp, num_classes), jnp.float32)
        self.q = jnp.zeros((1, num_classes), jnp.float32)  # broadcastable "0"
        self.beta = beta
        self.num_classes = num_classes
        self.lmbd = lmbd
        self.coef_step = coef_step

    def update_hist(self, out, index, mix_index=None, mixup_l=1.0):
        # Plain-JAX glue (state update, not the hot forward path).
        y_pred = jax.nn.softmax(out, axis=1)
        y_pred = y_pred / jnp.sum(y_pred, axis=1, keepdims=True)
        new_hist = self.beta * self.pred_hist[index] + (1.0 - self.beta) * y_pred
        self.pred_hist = self.pred_hist.at[index].set(new_hist)
        ph = self.pred_hist[index]
        ph_mix = ph if mix_index is None else ph[mix_index]
        self.q = mixup_l * ph + (1.0 - mixup_l) * ph_mix

    def forward(self, iteration, output, y_labeled, *, block_rows=512, num_cores=2):
        B, C = output.shape
        assert C == self.num_classes

        q = jnp.asarray(self.q, jnp.float32)
        if q.ndim == 0:
            q = jnp.zeros((1, C), jnp.float32)
        elif q.ndim == 1:
            q = q[None, :]
        q_is_row = q.shape[0] == 1

        # ---- batch tiling ------------------------------------------------
        b8 = _round_up(B, 8)
        tb = _round_up(min(block_rows, b8), 8)
        n_tiles = pl.cdiv(b8, tb)
        nc = max(1, min(num_cores, n_tiles))        # leading parallel axis
        tiles_per_core = pl.cdiv(n_tiles, nc)
        bp = nc * tiles_per_core * tb               # padded batch

        def pad_rows(x):
            return x if x.shape[0] == bp else jnp.pad(x, ((0, bp - x.shape[0]), (0, 0)))

        logits_p = pad_rows(output)                 # native dtype, no upcast
        y_p = pad_rows(y_labeled)                   # native dtype, no upcast

        row_spec = pl.BlockSpec((tb, C), lambda c, i: (c * tiles_per_core + i, 0))
        if q_is_row:
            q_in = q                                # (1, C): no broadcast/materialize
            q_spec = pl.BlockSpec((1, C), lambda c, i: (0, 0))
        else:
            q_in = pad_rows(q)
            q_spec = pl.BlockSpec((tb, C), lambda c, i: (c * tiles_per_core + i, 0))
        acc_spec = pl.BlockSpec((8, 128), lambda c, i: (c, 0))   # per-core accumulator

        kernel = functools.partial(
            _elr_plus_tile_kernel,
            num_classes=self.num_classes,
            true_b=B,
            tile_rows=tb,
            tiles_per_core=tiles_per_core,
        )

        bytes_in = int(logits_p.size * logits_p.dtype.itemsize
                       + y_p.size * y_p.dtype.itemsize
                       + q_in.size * q_in.dtype.itemsize)
        cost = pl.CostEstimate(
            flops=int(10 * bp * C),
            transcendentals=int(bp * (C + 2)),
            bytes_accessed=bytes_in + 2 * nc * 8 * 128 * 4,
        )

        ce_parts, reg_parts = pl.pallas_call(
            kernel,
            out_shape=(
                jax.ShapeDtypeStruct((nc * 8, 128), jnp.float32),
                jax.ShapeDtypeStruct((nc * 8, 128), jnp.float32),
            ),
            grid=(nc, tiles_per_core),
            in_specs=[row_spec, row_spec, q_spec],
            out_specs=(acc_spec, acc_spec),
            compiler_params=pltpu.CompilerParams(
                dimension_semantics=("parallel", "arbitrary")),
            cost_estimate=cost,
        )(logits_p, y_p, q_in)

        ce_sum = jnp.sum(ce_parts.reshape(nc, 8, 128)[:, 0, 0])   # one partial per core
        reg_sum = jnp.sum(reg_parts.reshape(nc, 8, 128)[:, 0, 0])
        coef = sigmoid_rampup(iteration, self.coef_step) * self.lmbd
        return ce_sum / B + coef * (reg_sum / B)

    __call__ = forward


def _reference_forward(loss_mod, iteration, output, y_labeled):
    """Pure-JAX reference for correctness check."""
    output = output.astype(jnp.float32)
    y = y_labeled.astype(jnp.float32)
    q = jnp.asarray(loss_mod.q, jnp.float32)
    q = jnp.broadcast_to(q, output.shape)
    y_pred = jax.nn.softmax(output, axis=1)
    y_pred = jnp.clip(y_pred, 0.0001, 1.0 - 0.0001)
    if loss_mod.num_classes == 100:
        y = y * q
        y = y / jnp.sum(y, axis=1, keepdims=True)
    ce = jnp.mean(-jnp.sum(y * jax.nn.log_softmax(output, axis=1), axis=-1))
    reg = jnp.mean(jnp.log(1.0 - jnp.sum(q * y_pred, axis=1)))
    return ce + sigmoid_rampup(iteration, loss_mod.coef_step) * (loss_mod.lmbd * reg)


if __name__ == "__main__":
    keys = jax.random.split(jax.random.PRNGKey(0), 10)

    # ---- case 1: small batch, C=10, q = [B, C] from update_hist -----------
    B, C, N = 8, 10, 32
    output = jax.random.normal(keys[0], (B, C), jnp.float32)
    labels = jax.random.randint(keys[1], (B,), 0, C)
    y_labeled = jax.nn.one_hot(labels, C, dtype=jnp.float32)

    mod = ELRPlusLoss(num_examp=N, num_classes=C, beta=0.3, lmbd=3.0, coef_step=0)
    mod.update_hist(jax.random.normal(keys[2], (B, C), jnp.float32), index=jnp.arange(B))
    loss = mod(5, output, y_labeled)
    jax.block_until_ready(loss)
    ref = _reference_forward(mod, 5, output, y_labeled)
    assert jnp.allclose(loss, ref, rtol=1e-5, atol=1e-5), (loss, ref)

    # ---- case 2: fresh module (q is a (1,C) zero row), bf16 logits --------
    mod2 = ELRPlusLoss(num_examp=N, num_classes=C)
    out_bf16 = output.astype(jnp.bfloat16)
    loss2 = mod2(0, out_bf16, y_labeled)
    jax.block_until_ready(loss2)
    ref2 = _reference_forward(mod2, 0, out_bf16.astype(jnp.float32), y_labeled)
    assert jnp.allclose(loss2, ref2, rtol=1e-5, atol=1e-5), (loss2, ref2)

    # ---- case 3: multi-tile + 2-core split + batch padding / masking ------
    B3 = 200
    out3 = jax.random.normal(keys[3], (B3, C), jnp.float32)
    y3 = jax.nn.one_hot(jax.random.randint(keys[4], (B3,), 0, C), C, dtype=jnp.float32)
    mod3 = ELRPlusLoss(num_examp=B3, num_classes=C)
    mod3.update_hist(out3 * 0.5, index=jnp.arange(B3))
    loss3 = mod3(3, out3, y3, block_rows=64)   # several tiles per core + padding
    jax.block_until_ready(loss3)
    ref3 = _reference_forward(mod3, 3, out3, y3)
    assert jnp.allclose(loss3, ref3, rtol=1e-5, atol=1e-5), (loss3, ref3)

    # ---- case 4: num_classes == 100 branch ---------------------------------
    B4, C4 = 16, 100
    out4 = jax.random.normal(keys[5], (B4, C4), jnp.float32)
    y4 = jax.nn.one_hot(jax.random.randint(keys[6], (B4,), 0, C4), C4, dtype=jnp.float32)
    mod4 = ELRPlusLoss(num_examp=B4, num_classes=C4)
    mod4.update_hist(jax.random.normal(keys[7], (B4, C4), jnp.float32), index=jnp.arange(B4))
    loss4 = mod4(2, out4, y4)
    jax.block_until_ready(loss4)
    ref4 = _reference_forward(mod4, 2, out4, y4)
    assert jnp.allclose(loss4, ref4, rtol=1e-5, atol=1e-5), (loss4, ref4)

    print("KERNEL_OK")
</pallas_src>

<mosaic_0001>
module attributes {stable_mosaic.version = 11 : i64} {
  func.func @_elr_plus_tile_kernel(%arg0: i32, %arg1: i32, %arg2: memref<8x10xf32, #tpu.memory_space<vmem>>, %arg3: memref<8x10xf32, #tpu.memory_space<vmem>>, %arg4: memref<8x10xf32, #tpu.memory_space<vmem>>, %arg5: memref<8x128xf32, #tpu.memory_space<vmem>>, %arg6: memref<8x128xf32, #tpu.memory_space<vmem>>) attributes {dimension_semantics = [#tpu.dimension_semantics<parallel>, #tpu.dimension_semantics<arbitrary>], iteration_bounds = array<i64: 1, 1>, scalar_prefetch = 0 : i64, scratch_operands = 0 : i64, tpu.core_type = #tpu.core_type<tc>, window_params = [{transform_indices = @transform_0, window_bounds = array<i64: 8, 10>}, {transform_indices = @transform_1, window_bounds = array<i64: 8, 10>}, {transform_indices = @transform_2, window_bounds = array<i64: 8, 10>}, {transform_indices = @transform_3, window_bounds = array<i64: 8, 128>}, {transform_indices = @transform_4, window_bounds = array<i64: 8, 128>}]} {
    %c0_i32 = arith.constant 0 : i32
    %0 = arith.cmpi eq, %arg1, %c0_i32 : i32
    %1 = arith.extui %0 : i1 to i32
    %c0_i32_0 = arith.constant 0 : i32
    %2 = arith.cmpi ne, %1, %c0_i32_0 : i32
    scf.if %2 {
      %cst_27 = arith.constant 0.000000e+00 : f32
      %65 = vector.broadcast %cst_27 : f32 to vector<8x128xf32>
      %c0_28 = arith.constant 0 : index
      %c0_29 = arith.constant 0 : index
      %66 = vector.load %arg5[%c0_28, %c0_29] : memref<8x128xf32, #tpu.memory_space<vmem>>, vector<8x128xf32>
      tpu.vector_store %arg5[%c0_28, %c0_29], %65 {strides = array<i32>} : memref<8x128xf32, #tpu.memory_space<vmem>>, vector<8x128xf32>,
      %cst_30 = arith.constant 0.000000e+00 : f32
      %67 = vector.broadcast %cst_30 : f32 to vector<8x128xf32>
      %c0_31 = arith.constant 0 : index
      %c0_32 = arith.constant 0 : index
      %68 = vector.load %arg6[%c0_31, %c0_32] : memref<8x128xf32, #tpu.memory_space<vmem>>, vector<8x128xf32>
      tpu.vector_store %arg6[%c0_31, %c0_32], %67 {strides = array<i32>} : memref<8x128xf32, #tpu.memory_space<vmem>>, vector<8x128xf32>,
    } else {
    }
    %c0 = arith.constant 0 : index
    %c0_1 = arith.constant 0 : index
    %3 = vector.load %arg2[%c0, %c0_1] : memref<8x10xf32, #tpu.memory_space<vmem>>, vector<8x10xf32>
    %c0_2 = arith.constant 0 : index
    %c0_3 = arith.constant 0 : index
    %4 = vector.load %arg3[%c0_2, %c0_3] : memref<8x10xf32, #tpu.memory_space<vmem>>, vector<8x10xf32>
    %c0_4 = arith.constant 0 : index
    %c0_5 = arith.constant 0 : index
    %5 = vector.load %arg4[%c0_4, %c0_5] : memref<8x10xf32, #tpu.memory_space<vmem>>, vector<8x10xf32>
    %cst = arith.constant dense<0xFF800000> : vector<8xf32>
    %6 = vector.multi_reduction <maximumf>, %3, %cst [1] : vector<8x10xf32> to vector<8xf32>
    %7 = vector.shape_cast %6 : vector<8xf32> to vector<8x1xf32>
    %8 = vector.broadcast %7 : vector<8x1xf32> to vector<8x10xf32>
    %9 = arith.subf %3, %8 : vector<8x10xf32>
    %10 = math.exp %9 : vector<8x10xf32>
    %cst_6 = arith.constant dense<0.000000e+00> : vector<8xf32>
    %11 = vector.multi_reduction <add>, %10, %cst_6 [1] : vector<8x10xf32> to vector<8xf32>
    %12 = vector.shape_cast %11 : vector<8xf32> to vector<8x1xf32>
    %cst_7 = arith.constant 1.000000e+00 : f32
    %13 = vector.broadcast %cst_7 : f32 to vector<8x1xf32>
    %14 = arith.divf %13, %12 : vector<8x1xf32>
    %15 = vector.broadcast %14 : vector<8x1xf32> to vector<8x10xf32>
    %16 = arith.mulf %10, %15 : vector<8x10xf32>
    %cst_8 = arith.constant 9.99999974E-5 : f32
    %cst_9 = arith.constant 0.999899983 : f32
    %17 = vector.broadcast %cst_8 : f32 to vector<8x10xf32>
    %18 = arith.maximumf %17, %16 : vector<8x10xf32>
    %19 = vector.broadcast %cst_9 : f32 to vector<8x10xf32>
    %20 = arith.minimumf %19, %18 : vector<8x10xf32>
    %21 = math.log %12 : vector<8x1xf32>
    %22 = vector.broadcast %21 : vector<8x1xf32> to vector<8x10xf32>
    %23 = arith.subf %9, %22 : vector<8x10xf32>
    %24 = arith.mulf %4, %23 : vector<8x10xf32>
    %cst_10 = arith.constant dense<0.000000e+00> : vector<8xf32>
    %25 = vector.multi_reduction <add>, %24, %cst_10 [1] : vector<8x10xf32> to vector<8xf32>
    %26 = vector.shape_cast %25 : vector<8xf32> to vector<8x1xf32>
    %cst_11 = arith.constant 0.000000e+00 : f32
    %27 = vector.broadcast %cst_11 : f32 to vector<8x1xf32>
    %28 = arith.subf %27, %26 : vector<8x1xf32>
    %29 = arith.mulf %5, %20 : vector<8x10xf32>
    %cst_12 = arith.constant dense<0.000000e+00> : vector<8xf32>
    %30 = vector.multi_reduction <add>, %29, %cst_12 [1] : vector<8x10xf32> to vector<8xf32>
    %31 = vector.shape_cast %30 : vector<8xf32> to vector<8x1xf32>
    %cst_13 = arith.constant 1.000000e+00 : f32
    %32 = vector.broadcast %cst_13 : f32 to vector<8x1xf32>
    %33 = arith.subf %32, %31 : vector<8x1xf32>
    %34 = math.log %33 : vector<8x1xf32>
    %c1_i32 = arith.constant 1 : i32
    %35 = arith.muli %arg0, %c1_i32 : i32
    %36 = arith.addi %35, %arg1 : i32
    %c8_i32 = arith.constant 8 : i32
    %37 = arith.muli %36, %c8_i32 : i32
    %38 = tpu.iota {dimensions = array<i32: 0>} : vector<8x1xi32>
    %39 = vector.broadcast %37 : i32 to vector<8x1xi32>
    %40 = arith.addi %39, %38 : vector<8x1xi32>
    %c8_i32_14 = arith.constant 8 : i32
    %41 = vector.broadcast %c8_i32_14 : i32 to vector<8x1xi32>
    %42 = arith.cmpi slt, %40, %41 : vector<8x1xi32>
    %cst_15 = arith.constant 0.000000e+00 : f32
    %43 = vector.broadcast %cst_15 : f32 to vector<8x1xf32>
    %44 = arith.select %42, %28, %43 : vector<8x1xi1>, vector<8x1xf32>
    %45 = vector.shape_cast %44 : vector<8x1xf32> to vector<1x8x1xf32>
    %cst_16 = arith.constant dense<0.000000e+00> : vector<1xf32>
    %46 = vector.multi_reduction <add>, %45, %cst_16 [1, 2] : vector<1x8x1xf32> to vector<1xf32>
    %47 = vector.shape_cast %46 : vector<1xf32> to vector<1x1x1xf32>
    %48 = vector.extract %47[0, 0, 0] : f32 from vector<1x1x1xf32>
    %49 = vector.broadcast %48 : f32 to vector<1x1xf32>
    %cst_17 = arith.constant 0.000000e+00 : f32
    %50 = vector.broadcast %cst_17 : f32 to vector<8x1xf32>
    %51 = arith.select %42, %34, %50 : vector<8x1xi1>, vector<8x1xf32>
    %52 = vector.shape_cast %51 : vector<8x1xf32> to vector<1x8x1xf32>
    %cst_18 = arith.constant dense<0.000000e+00> : vector<1xf32>
    %53 = vector.multi_reduction <add>, %52, %cst_18 [1, 2] : vector<1x8x1xf32> to vector<1xf32>
    %54 = vector.shape_cast %53 : vector<1xf32> to vector<1x1x1xf32>
    %55 = vector.extract %54[0, 0, 0] : f32 from vector<1x1x1xf32>
    %56 = vector.broadcast %55 : f32 to vector<1x1xf32>
    %c0_19 = arith.constant 0 : index
    %c0_20 = arith.constant 0 : index
    %57 = vector.load %arg5[%c0_19, %c0_20] : memref<8x128xf32, #tpu.memory_space<vmem>>, vector<8x128xf32>
    %58 = vector.broadcast %49 : vector<1x1xf32> to vector<8x128xf32>
    %59 = arith.addf %57, %58 : vector<8x128xf32>
    %c0_21 = arith.constant 0 : index
    %c0_22 = arith.constant 0 : index
    %60 = vector.load %arg5[%c0_21, %c0_22] : memref<8x128xf32, #tpu.memory_space<vmem>>, vector<8x128xf32>
    tpu.vector_store %arg5[%c0_21, %c0_22], %59 {strides = array<i32>} : memref<8x128xf32, #tpu.memory_space<vmem>>, vector<8x128xf32>,
    %c0_23 = arith.constant 0 : index
    %c0_24 = arith.constant 0 : index
    %61 = vector.load %arg6[%c0_23, %c0_24] : memref<8x128xf32, #tpu.memory_space<vmem>>, vector<8x128xf32>
    %62 = vector.broadcast %56 : vector<1x1xf32> to vector<8x128xf32>
    %63 = arith.addf %61, %62 : vector<8x128xf32>
    %c0_25 = arith.constant 0 : index
    %c0_26 = arith.constant 0 : index
    %64 = vector.load %arg6[%c0_25, %c0_26] : memref<8x128xf32, #tpu.memory_space<vmem>>, vector<8x128xf32>
    tpu.vector_store %arg6[%c0_25, %c0_26], %63 {strides = array<i32>} : memref<8x128xf32, #tpu.memory_space<vmem>>, vector<8x128xf32>,
    return
  }
  func.func @transform_0(%arg0: i32, %arg1: i32) -> (i32, i32) {
    %c1_i32 = arith.constant 1 : i32
    %0 = arith.muli %arg0, %c1_i32 : i32
    %1 = arith.addi %0, %arg1 : i32
    %c0_i32 = arith.constant 0 : i32
    %c0_i32_0 = arith.constant 0 : i32
    return %1, %c0_i32 : i32, i32
  }
  func.func @transform_1(%arg0: i32, %arg1: i32) -> (i32, i32) {
    %c1_i32 = arith.constant 1 : i32
    %0 = arith.muli %arg0, %c1_i32 : i32
    %1 = arith.addi %0, %arg1 : i32
    %c0_i32 = arith.constant 0 : i32
    %c0_i32_0 = arith.constant 0 : i32
    return %1, %c0_i32 : i32, i32
  }
  func.func @transform_2(%arg0: i32, %arg1: i32) -> (i32, i32) {
    %c1_i32 = arith.constant 1 : i32
    %0 = arith.muli %arg0, %c1_i32 : i32
    %1 = arith.addi %0, %arg1 : i32
    %c0_i32 = arith.constant 0 : i32
    %c0_i32_0 = arith.constant 0 : i32
    return %1, %c0_i32 : i32, i32
  }
  func.func @transform_3(%arg0: i32, %arg1: i32) -> (i32, i32) {
    %c0_i32 = arith.constant 0 : i32
    %c0_i32_0 = arith.constant 0 : i32
    return %arg0, %c0_i32 : i32, i32
  }
  func.func @transform_4(%arg0: i32, %arg1: i32) -> (i32, i32) {
    %c0_i32 = arith.constant 0 : i32
    %c0_i32_0 = arith.constant 0 : i32
    return %arg0, %c0_i32 : i32, i32
  }
}

</mosaic_0001>

<bundles_post_ra>
// kernel: tpu_custom_call.1
= control target key start
LH: loop header
LB: loop body
LE: loop exit
PB: predicated region body
PF: predicated region fallthrough
CT: control target
= control target key end

     0   :  { %10 = vsyncpa [#allocation3], 0  ;;  %s402_s0 = inlined_call_operand.hbm [shape: f32[8,10], index: 0, kind: input, shape index: {}]   ;;  %s403_s1 = inlined_call_operand.hbm [shape: f32[8,10], index: 1, kind: input, shape index: {}]   ;;  %s404_s2 = inlined_call_operand.hbm [shape: f32[8,10], index: 2, kind: input, shape index: {}]   ;;  %s405_s3 = inlined_call_operand.hbm [shape: f32[8,128], index: 3, kind: output, shape index: {0}]   ;;  %s406_s4 = inlined_call_operand.hbm [shape: f32[8,128], index: 4, kind: output, shape index: {1}]  }
   0x1   :  { %11 = vsyncpa [#allocation6], 0 }
   0x2   :  { %12 = vsyncpa [#allocation4], 0 }
   0x3   :  { %13 = vsyncpa [#allocation10], 0  ;;  %s308_s15 = smov [#allocation5]   ;;  %s309_s17 = smov [#allocation2]  }
   0x4   :  { %s36_s16 = sshll.u32 %s308_s15, 4  ;;  %s23_s18 = sshll.u32 %s309_s17, 4  ;;  %s37_s16 = int_to_ptr.vmem [resolvable:$true] %s36_s16  ;;  %s24_s18 = int_to_ptr.vmem [resolvable:$true] %s23_s18 }
   0x5   :  { %s190_s21 = scalar_lea.hbm %s403_s1, 128 }
   0x6   :  { %p191_p0 = scmp.ne.s32.totalorder %s403_s1, %s190_s21  ;;  %p194_p1 = scmp.lt.u32.totalorder %s190_s21, %s403_s1 }
   0x8   :  { %p196_p2 = pnand %p194_p1, %p191_p0 }
   0xa   :  { %199 = shalt.err (!%p196_p2)
}
   0xb   :  { %s200_s26 = scalar_lea.vmem %s37_s16, 128  ;;  %p205_p4 = scmp.lt.s32.totalorder %s37_s16, %s37_s16 }
   0xc   :  { %p201_p3 = scmp.ne.s32.totalorder %s37_s16, %s200_s26  ;;  %p206_p5 = scmp.lt.s32.totalorder %s200_s26, %s200_s26 }
   0xe   :  { %p207_p6 = por %p206_p5, %p205_p4 }
  0x10   :  { %p208_p7 = pnand %p207_p6, %p201_p3 }
  0x12   :  { %211 = shalt.err (!%p208_p7)
}
  0x13   :  { %39 = dma.hbm_to_vmem [thread:$0]  %s403_s1, 128, %s37_s16, [#allocation6]  }
  0x14   :  { %s212_s5 = scalar_lea.hbm %s402_s0, 128 }
  0x15   :  { %p213_p8 = scmp.ne.s32.totalorder %s402_s0, %s212_s5  ;;  %p216_p9 = scmp.lt.u32.totalorder %s212_s5, %s402_s0 }
  0x17   :  { %p218_p10 = pnand %p216_p9, %p213_p8 }
  0x19   :  { %221 = shalt.err (!%p218_p10)
}
  0x1a   :  { %s222_s10 = scalar_lea.vmem %s24_s18, 128  ;;  %p227_p12 = scmp.lt.s32.totalorder %s24_s18, %s24_s18 }
  0x1b   :  { %p223_p11 = scmp.ne.s32.totalorder %s24_s18, %s222_s10  ;;  %p228_p13 = scmp.lt.s32.totalorder %s222_s10, %s222_s10 }
  0x1d   :  { %p229_p0 = por %p228_p13, %p227_p12 }
  0x1f   :  { %p230_p1 = pnand %p229_p0, %p223_p11 }
  0x21   :  { %233 = shalt.err (!%p230_p1)
}
  0x22   :  { %26 = dma.hbm_to_vmem [thread:$0]  %s402_s0, 128, %s24_s18, [#allocation3]  }
  0x23   :  { %s310_s12 = smov [#allocation7]   ;;  %s234_s16 = scalar_lea.hbm %s404_s2, 128 }
  0x24   :  { %s49_s13 = sshll.u32 %s310_s12, 4  ;;  %p235_p2 = scmp.ne.s32.totalorder %s404_s2, %s234_s16  ;;  %s50_s13 = int_to_ptr.vmem [resolvable:$true] %s49_s13 }
  0x25   :  { %p238_p3 = scmp.lt.u32.totalorder %s234_s16, %s404_s2 }
  0x27   :  { %p240_p4 = pnand %p238_p3, %p235_p2 }
  0x29   :  { %243 = shalt.err (!%p240_p4)
}
  0x2a   :  { %s244_s22 = scalar_lea.vmem %s50_s13, 128  ;;  %p249_p6 = scmp.lt.s32.totalorder %s50_s13, %s50_s13 }
  0x2b   :  { %p245_p5 = scmp.ne.s32.totalorder %s50_s13, %s244_s22  ;;  %p250_p7 = scmp.lt.s32.totalorder %s244_s22, %s244_s22 }
  0x2d   :  { %p251_p8 = por %p250_p7, %p249_p6 }
  0x2f   :  { %p252_p9 = pnand %p251_p8, %p245_p5 }
  0x31   :  { %255 = shalt.err (!%p252_p9)
}
  0x32   :  { %52 = dma.hbm_to_vmem [thread:$0]  %s404_s2, 128, %s50_s13, [#allocation6]  }
  0x33   :  { %300 = dma.done.wait [#allocation3], 128  }
  0x34   :  { %301 = vsyncadd [#allocation3], 4294967168 }
  0x35   :  { %302 = dma.done.wait [#allocation6], 256  }
  0x36   :  { %303 = vsyncadd [#allocation6], 4294967040  ;;  %vm74_vm0 = vcmask 80896   ;;  %v71_v0 = vld [vmem:[#allocation2] sm:$0xff]  ;;  %v73_v13 = vld [vmem:[#allocation7] sm:$0xff]  ;;  %vm112_vm1 = vcmask 7168  }
  0x37   :  { %v75_v1 = vsel %vm74_vm0, %v71_v0, -inf  ;;  %v72_v16 = vld [vmem:[#allocation5] sm:$0xff]  ;;  %s311_s2 = smov [#allocation8]  }
  0x38   :  { %76 = vmax.xlane.f32.xlu0 %v75_v1  ;;  %s148_s23 = sshll.u32 %s311_s2, 4  ;;  %s149_s23 = int_to_ptr.vmem [resolvable:$true] %s148_s23 }
  0x39   :  { %s256_s25 = scalar_lea.vmem %s149_s23, 128  ;;  %p261_p11 = scmp.lt.s32.totalorder %s149_s23, %s149_s23 }
  0x3a   :  { %p257_p10 = scmp.ne.s32.totalorder %s149_s23, %s256_s25  ;;  %p262_p12 = scmp.lt.s32.totalorder %s256_s25, %s256_s25 }
  0x3c   :  { %p263_p13 = por %p262_p12, %p261_p11 }
  0x3e   :  { %p264_p0 = pnand %p263_p13, %p257_p10 }
  0xc5   :  { %v77_v2 = vpop.xlane.xlu0 %76 }
  0xc6   :  { %v78_v3 = vsub.f32 %v71_v0, %v77_v2 }
  0xc8   :  { %v79_v4 = vmul.f32 1.442695, %v78_v3 }
  0xca   :  { %182 = vpow2.f32 %v79_v4 }
  0xd4   :  { %v183_v5 = vpop.eup %182 }
  0xd5   :  { %v81_v6 = vsel %vm74_vm0, %v183_v5, 0.0 }
  0xd6   :  { %82 = vadd.xlane.f32.xlu0 %v81_v6 }
 0x163   :  { %v83_v7 = vpop.xlane.xlu0 %82 }
 0x164   :  { %184 = vrcp.f32 %v83_v7 }
 0x165   :  { %186 = vlog2.f32 %v83_v7 }
 0x16e   :  { %v185_v8 = vpop.eup %184 }
 0x16f   :  { %v187_v9 = vpop.eup %186  ;;  %v86_v10 = vmul.f32 %v185_v8, %v183_v5 }
 0x170   :  { %v90_v11 = vmul.f32 0.6931472, %v187_v9 }
 0x171   :  { %v87_v12 = vmax.f32 %v86_v10, 0.0001 }
 0x172   :  { %v91_v15 = vsub.f32 %v78_v3, %v90_v11 }
 0x173   :  { %v88_v14 = vmin.f32 %v87_v12, 0.9999 }
 0x174   :  { %v92_v19 = vmul.f32 %v91_v15, %v72_v16 }
 0x175   :  { %v97_v17 = vmul.f32 %v88_v14, %v73_v13 }
 0x176   :  { %v93_v20 = vsel %vm74_vm0, %v92_v19, 0.0 }
 0x177   :  { %v98_v18 = vsel %vm74_vm0, %v97_v17, 0.0 }
 0x178   :  { %99 = vadd.xlane.f32.xlu1 %v98_v18 }
 0x17c   :  { %94 = vadd.xlane.f32.xlu1 %v93_v20 }
 0x205   :  { %v100_v21 = vpop.xlane.xlu1 %99 }
 0x206   :  { %v101_v22 = vsub.f32 1.0, %v100_v21 }
 0x208   :  { %188 = vlog2.f32 %v101_v22 }
 0x209   :  { %v95_v23 = vpop.xlane.xlu1 %94 }
 0x20a   :  { %v96_v24 = vsub.f32 0.0, %v95_v23 }
 0x20c   :  { %v113_v25 = vsel %vm112_vm1, %v96_v24, 0.0 }
 0x20d   :  { %114 = vadd.xlane.f32.xlu0 %v113_v25 }
 0x212   :  { %v189_v26 = vpop.eup %188 }
 0x213   :  { %v103_v27 = vmul.f32 0.6931472, %v189_v26 }
 0x215   :  { %v124_v28 = vsel %vm112_vm1, %v103_v27, 0.0 }
 0x216   :  { %125 = vadd.xlane.f32.xlu1 %v124_v28 }
 0x29a   :  { %v115_v29 = vpop.xlane.xlu0 %114 }
 0x29b   :  { %v116_v30 = vrot.slane %v115_v29, 4 }
 0x29d   :  { %v117_v31 = vadd.f32 %v116_v30, %v115_v29 }
 0x29f   :  { %v118_v32 = vrot.slane %v117_v31, 2 }
 0x2a1   :  { %v119_v33 = vadd.f32 %v118_v32, %v117_v31 }
 0x2a3   :  { %v126_v34 = vpop.xlane.xlu1 %125  ;;  %v120_v35 = vrot.slane %v119_v33, 1 }
 0x2a4   :  { %v127_v36 = vrot.slane %v126_v34, 4 }
 0x2a5   :  { %v121_v37 = vadd.f32 %v120_v35, %v119_v33 }
 0x2a6   :  { %v128_v38 = vadd.f32 %v127_v36, %v126_v34 }
 0x2a7   :  { %172 = vpush %v121_v37 }
 0x2a8   :  { %v129_v39 = vrot.slane %v128_v38, 2 }
 0x2aa   :  { %v130_v40 = vadd.f32 %v129_v39, %v128_v38 }
 0x2ac   :  { %v131_v41 = vrot.slane %v130_v40, 1 }
 0x2ae   :  { %v132_v42 = vadd.f32 %v131_v41, %v130_v40 }
 0x2b0   :  { %174 = vpush %v132_v42 }
 0x2d8   :  { %s173_s24 = spop %172 }
 0x2d9   :  { %v135_v43 = vstv %s173_s24 }
 0x2da   :  { %137 = vst [vmem:[#allocation8] sm:$0xff] %v135_v43 }
 0x2db   :  { %267 = shalt.err (!%p264_p0)
}
 0x2dc   :  { %s268_s28 = scalar_lea.hbm %s405_s3, 128 }
 0x2dd   :  { %p269_p1 = scmp.ne.s32.totalorder %s405_s3, %s268_s28  ;;  %p272_p2 = scmp.lt.u32.totalorder %s268_s28, %s405_s3 }
 0x2df   :  { %p274_p3 = pnand %p272_p2, %p269_p1 }
 0x2e1   :  { %277 = shalt.err (!%p274_p3)
}
 0x2e2   :  { %151 = dma.vmem_to_hbm [thread:$0]  %s149_s23, 128, %s405_s3, [#allocation4]  }
 0x2e3   :  { %s312_s9 = smov [#allocation9]   ;;  %s175_s1 = spop %174 }
 0x2e4   :  { %s158_s10 = sshll.u32 %s312_s9, 4  ;;  %v139_v44 = vstv %s175_s1  ;;  %s159_s10 = int_to_ptr.vmem [resolvable:$true] %s158_s10 }
 0x2e5   :  { %141 = vst [vmem:[#allocation9] sm:$0xff] %v139_v44  ;;  %s278_s11 = scalar_lea.vmem %s159_s10, 128  ;;  %p283_p5 = scmp.lt.s32.totalorder %s159_s10, %s159_s10 }
 0x2e6   :  { %p279_p4 = scmp.ne.s32.totalorder %s159_s10, %s278_s11  ;;  %p284_p6 = scmp.lt.s32.totalorder %s278_s11, %s278_s11 }
 0x2e8   :  { %p285_p7 = por %p284_p6, %p283_p5 }
 0x2ea   :  { %p286_p8 = pnand %p285_p7, %p279_p4 }
 0x2ec   :  { %289 = shalt.err (!%p286_p8)
}
 0x2ed   :  { %s290_s14 = scalar_lea.hbm %s406_s4, 128 }
 0x2ee   :  { %p291_p9 = scmp.ne.s32.totalorder %s406_s4, %s290_s14  ;;  %p294_p10 = scmp.lt.u32.totalorder %s290_s14, %s406_s4 }
 0x2f0   :  { %p296_p11 = pnand %p294_p10, %p291_p9 }
 0x2f2   :  { %299 = shalt.err (!%p296_p11)
}
 0x2f3   :  { %161 = dma.vmem_to_hbm [thread:$0]  %s159_s10, 128, %s406_s4, [#allocation10]  }
 0x2f4   :  { %304 = dma.done.wait [#allocation4], 128  }
 0x2f5   :  { %305 = vsyncadd [#allocation4], 4294967168 }
 0x2f6   :  { %306 = dma.done.wait [#allocation10], 128  }
 0x2f7   :  { %307 = vsyncadd [#allocation10], 4294967168 }
 0x2f8   :  { %168 = vsyncpa [#allocation3], 1 }
 0x2f9   :  { %169 = vsyncpa [#allocation6], 1 }
 0x2fa   :  { %170 = vsyncpa [#allocation4], 1 }
 0x2fb   :  { %171 = vsyncpa [#allocation10], 1 }

</bundles_post_ra>
